<compile_context>
chip_gen: v7x
topology: tpu7x:2x2x1
jax: 0.10.0
libtpu: 0.0.40
codegen_flags: <defaults>
</compile_context>

<pallas_src>
import jax
import jax.numpy as jnp
from jax.experimental import pallas as pl
from jax.experimental.pallas import tpu as pltpu

_MIB = 1024 * 1024


def _round_up(x, m):
    return ((x + m - 1) // m) * m


# ---------------------------------------------------------------------------
# Kernels
# ---------------------------------------------------------------------------
def _linear_fused_kernel(x_ref, w_ref, b_ref, o_ref):
    """out = x @ w + b for one (TM, TN) tile; whole contraction in one pass."""
    acc = jnp.dot(x_ref[...], w_ref[...], preferred_element_type=jnp.float32)
    o_ref[...] = (acc + b_ref[...].astype(jnp.float32)).astype(o_ref.dtype)


def _linear_acc_kernel(x_ref, w_ref, b_ref, o_ref, acc_ref):
    """Split-K variant: accumulate partial products in a VMEM f32 scratch."""
    k = pl.program_id(2)

    @pl.when(k == 0)
    def _():
        acc_ref[...] = jnp.zeros_like(acc_ref)

    acc_ref[...] += jnp.dot(x_ref[...], w_ref[...],
                            preferred_element_type=jnp.float32)

    @pl.when(k == pl.num_programs(2) - 1)
    def _():
        o_ref[...] = (acc_ref[...] + b_ref[...].astype(jnp.float32)
                      ).astype(o_ref.dtype)


# ---------------------------------------------------------------------------
# Per-generation VMEM budgeting & tile planning
# ---------------------------------------------------------------------------
def _vmem_budget_and_limit():
    """(planner budget, scoped-VMEM limit) in bytes, per TPU generation."""
    cap = None
    try:
        info = pltpu.get_tpu_info()
        for name in ("vmem_capacity_bytes", "vmem_size_bytes", "vmem_bytes"):
            v = getattr(info, name, None)
            if v:
                cap = int(v)
                break
    except Exception:
        cap = None
    if not cap:
        cap = 64 * _MIB  # conservative default == v7x per-core VMEM
    # Requested scoped-VMEM limit: leave headroom for Mosaic internal scratch.
    # v5e/v6e (128 MiB physical) -> 100 MiB; v7x (64 MiB per core) -> 48 MiB.
    limit = int(max(24 * _MIB, min(cap - 16 * _MIB, 100 * _MIB)))
    # Planner budget: extra slack below the requested limit.
    budget = (limit * 3) // 4
    return budget, limit


def _plan_tiles(M, F, H_pad, itemsize, budget):
    """Pick (TM, TN, TK, split_k).

    VMEM accounting counts the default 2x double-buffering of every BlockSpec
    operand (x, w, b, out) plus the single-buffered f32 accumulator when the
    contraction dim is split.
    """
    m_cap = max(8, _round_up(M, 8))
    tm_cands = [t for t in (512, 256, 128, 64, 32, 16, 8) if t <= m_cap]
    if not tm_cands:
        tm_cands = [8]
    tn_cands = [H_pad] + [t for t in (1024, 512, 256, 128) if t < H_pad]

    def fits(tm, tn, tk, split_k):
        used = 2 * itemsize * (tm * tk + tk * tn + 8 * tn + tm * tn)
        if split_k:
            used += 4 * tm * tn          # f32 accumulator scratch
        return used <= budget

    # Pass 1: whole weight VMEM-resident (grid_n == grid_k == 1), x unpadded,
    # MXU/roofline-friendly row tile.
    for tm in tm_cands:
        if (tm >= 128 or tm == tm_cands[0]) and fits(tm, H_pad, F, False):
            return tm, H_pad, F, False
    # Pass 2: split H into weight column strips (still no K split, x unpadded).
    for tm in tm_cands:
        for tn in tn_cands:
            if fits(tm, tn, F, False):
                return tm, tn, F, False
    # Pass 3: split the contraction dim too (x / w get zero-padded along F).
    for tk in (1024, 512, 256, 128):
        for tm in tm_cands:
            for tn in tn_cands:
                if fits(tm, tn, tk, True):
                    return tm, tn, tk, True
    return 8, 128, 128, True  # last-ditch minimal tiles


# ---------------------------------------------------------------------------
# Pallas wrapper for the Linear layer
# ---------------------------------------------------------------------------
def _linear_pallas(x2d, w, b, *, planner_budget_bytes=None):
    """out = x2d @ w + b via a tiled, pipelined Pallas TPU kernel.

    `planner_budget_bytes` only overrides the tile planner's VMEM budget
    (used in tests to force the split-K path); the compiler's scoped-VMEM
    limit is always the per-generation value.
    """
    M, F = x2d.shape
    Fw, H = w.shape
    assert Fw == F, (Fw, F)
    dtype = x2d.dtype
    itemsize = jnp.dtype(dtype).itemsize

    H_pad = _round_up(H, 128)
    budget, vmem_limit = _vmem_budget_and_limit()
    if planner_budget_bytes is not None:
        budget = planner_budget_bytes

    TM, TN, TK, split_k = _plan_tiles(M, F, H_pad, itemsize, budget)
    F_pad = _round_up(F, TK) if split_k else F

    # Remaining HBM copies: zero-pad weight/bias along H (tiny, O(F*H)); x/w
    # are padded along F only in the rare split-K regime.  x is NOT padded
    # along M and the output is never sliced along M.
    x_in = x2d if F_pad == F else jnp.pad(x2d, ((0, 0), (0, F_pad - F)))
    w_in = w
    if F_pad != F or H_pad != H:
        w_in = jnp.pad(w, ((0, F_pad - F), (0, H_pad - H)))
    b2 = b.reshape(1, H)
    b_in = b2 if H_pad == H else jnp.pad(b2, ((0, 0), (0, H_pad - H)))

    grid_m = pl.cdiv(M, TM)      # ragged last tile: garbage rows get clipped
    grid_n = pl.cdiv(H_pad, TN)
    grid_k = pl.cdiv(F_pad, TK)

    if grid_k == 1:
        kernel = _linear_fused_kernel
        scratch_shapes = []
    else:
        kernel = _linear_acc_kernel
        scratch_shapes = [pltpu.VMEM((TM, TN), jnp.float32)]

    cost = pl.CostEstimate(
        flops=2 * M * F_pad * H_pad,
        transcendentals=0,
        bytes_accessed=itemsize * (M * F_pad + F_pad * H_pad + H_pad
                                   + M * H_pad),
    )

    out_p = pl.pallas_call(
        kernel,
        out_shape=jax.ShapeDtypeStruct((M, H_pad), dtype),
        grid_spec=pltpu.PrefetchScalarGridSpec(
            num_scalar_prefetch=0,
            grid=(grid_m, grid_n, grid_k),
            in_specs=[
                # Streamed row tiles of x (full-F block when grid_k == 1;
                # full-dim blocks are exempt from the 128-lane rule).
                pl.BlockSpec((TM, TK), lambda i, j, k: (i, k)),
                # Weight tile; VMEM-resident when grid_n == grid_k == 1.
                pl.BlockSpec((TK, TN), lambda i, j, k: (k, j)),
                # Bias strip.
                pl.BlockSpec((1, TN), lambda i, j, k: (0, j)),
            ],
            out_specs=pl.BlockSpec((TM, TN), lambda i, j, k: (i, j)),
            scratch_shapes=scratch_shapes,
        ),
        compiler_params=pltpu.CompilerParams(
            # M / N tiles are independent -> shard across TCs on v7x;
            # K (reduction) is last and "arbitrary".
            dimension_semantics=("parallel", "parallel", "arbitrary"),
            vmem_limit_bytes=vmem_limit,
        ),
        cost_estimate=cost,
    )(x_in, w_in, b_in)

    # Lane padding on the output is sliced away only when H % 128 != 0.
    return out_p if H_pad == H else out_p[:, :H]


def wrap_for_rnn_forward(x, w, b, *, planner_budget_bytes=None):
    """JAX/Pallas equivalent of WrapForRNN(Linear(F, H)).forward(x).

    x: (seq_len, batch, feature)  ->  (seq_len, batch, hidden)
    """
    assert x.ndim == 3
    seq_len, batch_size, feature_dim = x.shape
    x_flat = x.reshape(seq_len * batch_size, feature_dim)   # view in PyTorch
    out_flat = _linear_pallas(x_flat, w, b,
                              planner_budget_bytes=planner_budget_bytes)
    return out_flat.reshape(seq_len, batch_size, -1)         # view back


if __name__ == "__main__":
    def _ref(x, w, b):
        s, bsz, f = x.shape
        return (x.reshape(s * bsz, f).astype(jnp.float32)
                @ w.astype(jnp.float32)
                + b.astype(jnp.float32)).reshape(s, bsz, -1)

    key = jax.random.PRNGKey(0)

    # 1) Small shapes consistent with the (seq, batch, feature) contract.
    SEQ, BATCH, FEAT, HIDDEN = 8, 2, 16, 32
    k1, k2, k3, key = jax.random.split(key, 4)
    x = jax.random.normal(k1, (SEQ, BATCH, FEAT), dtype=jnp.float32)
    w = jax.random.normal(k2, (FEAT, HIDDEN), dtype=jnp.float32) * 0.05
    b = jax.random.normal(k3, (HIDDEN,), dtype=jnp.float32) * 0.05
    out = jax.block_until_ready(wrap_for_rnn_forward(x, w, b))
    assert out.shape == (SEQ, BATCH, HIDDEN)
    assert jnp.allclose(out, _ref(x, w, b), atol=1e-5, rtol=1e-5)

    # 2) Larger M -> multi-step pipelined grid (TM = 512, grid_m = 2).
    SEQ2, BATCH2, FEAT2, HIDDEN2 = 64, 16, 48, 96
    k1, k2, k3, key = jax.random.split(key, 4)
    x2 = jax.random.normal(k1, (SEQ2, BATCH2, FEAT2), dtype=jnp.float32)
    w2 = jax.random.normal(k2, (FEAT2, HIDDEN2), dtype=jnp.float32) * 0.05
    b2 = jax.random.normal(k3, (HIDDEN2,), dtype=jnp.float32) * 0.05
    out2 = jax.block_until_ready(wrap_for_rnn_forward(x2, w2, b2))
    assert out2.shape == (SEQ2, BATCH2, HIDDEN2)
    assert jnp.allclose(out2, _ref(x2, w2, b2), atol=1e-4, rtol=1e-4)

    # 3) M not a multiple of TM -> ragged last row tile (OOB rows clipped).
    SEQ3, BATCH3, FEAT3, HIDDEN3 = 37, 5, 64, 128
    k1, k2, k3, key = jax.random.split(key, 4)
    x3 = jax.random.normal(k1, (SEQ3, BATCH3, FEAT3), dtype=jnp.float32)
    w3 = jax.random.normal(k2, (FEAT3, HIDDEN3), dtype=jnp.float32) * 0.05
    b3 = jax.random.normal(k3, (HIDDEN3,), dtype=jnp.float32) * 0.05
    out3 = jax.block_until_ready(wrap_for_rnn_forward(x3, w3, b3))
    assert out3.shape == (SEQ3, BATCH3, HIDDEN3)
    assert jnp.allclose(out3, _ref(x3, w3, b3), atol=1e-4, rtol=1e-4)

    # 4) bf16 activations/weights -> bf16 MXU path with f32 accumulation.
    xb = x2.astype(jnp.bfloat16)
    wb = w2.astype(jnp.bfloat16)
    out4 = jax.block_until_ready(wrap_for_rnn_forward(xb, wb, b2))
    ref4 = (xb.reshape(-1, FEAT2).astype(jnp.float32)
            @ wb.astype(jnp.float32) + b2).reshape(SEQ2, BATCH2, HIDDEN2)
    assert out4.dtype == jnp.bfloat16
    assert jnp.allclose(out4.astype(jnp.float32), ref4, atol=5e-2, rtol=5e-2)

    # 5) Force the split-N / split-K fallback (planner budget shrunk) so the
    #    accumulator kernel path is exercised on-device.
    SEQ5, BATCH5, FEAT5, HIDDEN5 = 16, 16, 512, 256
    k1, k2, k3, key = jax.random.split(key, 4)
    x5 = jax.random.normal(k1, (SEQ5, BATCH5, FEAT5), dtype=jnp.float32)
    w5 = jax.random.normal(k2, (FEAT5, HIDDEN5), dtype=jnp.float32) * 0.02
    b5 = jax.random.normal(k3, (HIDDEN5,), dtype=jnp.float32) * 0.02
    out5 = jax.block_until_ready(
        wrap_for_rnn_forward(x5, w5, b5, planner_budget_bytes=512 * 1024))
    assert out5.shape == (SEQ5, BATCH5, HIDDEN5)
    assert jnp.allclose(out5, _ref(x5, w5, b5), atol=1e-3, rtol=1e-3)

    print("KERNEL_OK")
</pallas_src>

<mosaic_0001>
module attributes {stable_mosaic.version = 11 : i64} {
  func.func @_linear_fused_kernel(%arg0: i32, %arg1: i32, %arg2: i32, %arg3: memref<16x16xf32, #tpu.memory_space<vmem>>, %arg4: memref<16x128xf32, #tpu.memory_space<vmem>>, %arg5: memref<1x128xf32, #tpu.memory_space<vmem>>, %arg6: memref<16x128xf32, #tpu.memory_space<vmem>>) attributes {dimension_semantics = [#tpu.dimension_semantics<parallel>, #tpu.dimension_semantics<parallel>, #tpu.dimension_semantics<arbitrary>], iteration_bounds = array<i64: 1, 1, 1>, scalar_prefetch = 0 : i64, scratch_operands = 0 : i64, tpu.core_type = #tpu.core_type<tc>, window_params = [{transform_indices = @transform_0, window_bounds = array<i64: 16, 16>}, {transform_indices = @transform_1, window_bounds = array<i64: 16, 128>}, {transform_indices = @transform_2, window_bounds = array<i64: 1, 128>}, {transform_indices = @transform_3, window_bounds = array<i64: 16, 128>}]} {
    %c0 = arith.constant 0 : index
    %c0_0 = arith.constant 0 : index
    %0 = vector.load %arg3[%c0, %c0_0] : memref<16x16xf32, #tpu.memory_space<vmem>>, vector<16x16xf32>
    %c0_1 = arith.constant 0 : index
    %c0_2 = arith.constant 0 : index
    %1 = vector.load %arg4[%c0_1, %c0_2] : memref<16x128xf32, #tpu.memory_space<vmem>>, vector<16x128xf32>
    %cst = arith.constant dense<0.000000e+00> : vector<16x128xf32>
    %2 = tpu.matmul %0, %1, %cst {dimension_numbers = #tpu.dot_dimension_numbers<[1], [0], [0], [1], [0, 0, 1, 1], [], []>} : vector<16x16xf32>, vector<16x128xf32>, vector<16x128xf32> -> vector<16x128xf32>
    %c0_3 = arith.constant 0 : index
    %c0_4 = arith.constant 0 : index
    %3 = vector.load %arg5[%c0_3, %c0_4] : memref<1x128xf32, #tpu.memory_space<vmem>>, vector<1x128xf32>
    %4 = vector.broadcast %3 : vector<1x128xf32> to vector<16x128xf32>
    %5 = arith.addf %2, %4 : vector<16x128xf32>
    %c0_5 = arith.constant 0 : index
    %c0_6 = arith.constant 0 : index
    %6 = vector.load %arg6[%c0_5, %c0_6] : memref<16x128xf32, #tpu.memory_space<vmem>>, vector<16x128xf32>
    tpu.vector_store %arg6[%c0_5, %c0_6], %5 {strides = array<i32>} : memref<16x128xf32, #tpu.memory_space<vmem>>, vector<16x128xf32>,
    return
  }
  func.func @transform_0(%arg0: i32, %arg1: i32, %arg2: i32) -> (i32, i32) {
    %c0_i32 = arith.constant 0 : i32
    return %arg0, %arg2 : i32, i32
  }
  func.func @transform_1(%arg0: i32, %arg1: i32, %arg2: i32) -> (i32, i32) {
    %c0_i32 = arith.constant 0 : i32
    return %arg2, %arg1 : i32, i32
  }
  func.func @transform_2(%arg0: i32, %arg1: i32, %arg2: i32) -> (i32, i32) {
    %c0_i32 = arith.constant 0 : i32
    %c0_i32_0 = arith.constant 0 : i32
    return %c0_i32, %arg1 : i32, i32
  }
  func.func @transform_3(%arg0: i32, %arg1: i32, %arg2: i32) -> (i32, i32) {
    %c0_i32 = arith.constant 0 : i32
    return %arg0, %arg1 : i32, i32
  }
}

</mosaic_0001>

<bundles_post_ra>
// kernel: tpu_custom_call.1
= control target key start
LH: loop header
LB: loop body
LE: loop exit
PB: predicated region body
PF: predicated region fallthrough
CT: control target
= control target key end

     0   :  { %8 = vsyncpa [#allocation3], 0  ;;  %s324_s0 = inlined_call_operand.hbm [shape: f32[16,16], index: 0, kind: input, shape index: {}]   ;;  %s325_s1 = inlined_call_operand.hbm [shape: f32[16,128], index: 1, kind: input, shape index: {}]   ;;  %s326_s2 = inlined_call_operand.vmem [shape: f32[1,128], index: 2, kind: input, shape index: {}]   ;;  %s327_s3 = inlined_call_operand.hbm [shape: f32[16,128], index: 3, kind: output, shape index: {}]  }
   0x1   :  { %9 = vsyncpa [#allocation6], 0 }
   0x2   :  { %10 = vsyncpa [#allocation4], 0  ;;  %s251_s12 = smov [#allocation2]   ;;  %s179_s16 = scalar_lea.hbm %s324_s0, 256 }
   0x3   :  { %s16_s13 = sshll.u32 %s251_s12, 4  ;;  %p180_p0 = scmp.ne.s32.totalorder %s324_s0, %s179_s16  ;;  %s17_s13 = int_to_ptr.vmem [resolvable:$true] %s16_s13 }
   0x4   :  { %p183_p1 = scmp.lt.u32.totalorder %s179_s16, %s324_s0 }
   0x6   :  { %p185_p2 = pnand %p183_p1, %p180_p0 }
   0x8   :  { %188 = shalt.err (!%p185_p2)
}
   0x9   :  { %s189_s21 = scalar_lea.vmem %s17_s13, 256  ;;  %p194_p4 = scmp.lt.s32.totalorder %s17_s13, %s17_s13 }
   0xa   :  { %p190_p3 = scmp.ne.s32.totalorder %s17_s13, %s189_s21  ;;  %p195_p5 = scmp.lt.s32.totalorder %s189_s21, %s189_s21 }
   0xc   :  { %p196_p6 = por %p195_p5, %p194_p4 }
   0xe   :  { %p197_p7 = pnand %p196_p6, %p190_p3 }
  0x10   :  { %200 = shalt.err (!%p197_p7)
}
  0x11   :  { %s252_s22 = smov 128   ;;  %s253_s23 = smov 8  }
  0x12   :  { %22 = dma.hbm_to_vmem [thread:$0]  %s324_s0, 256, %s17_s13, [#allocation3], %s252_s22, %s252_s22, %s253_s23  }
  0x13   :  { %s254_s26 = smov [#allocation5]   ;;  %s201_s30 = scalar_lea.hbm %s325_s1, 256 }
  0x14   :  { %s28_s27 = sshll.u32 %s254_s26, 4  ;;  %p202_p8 = scmp.ne.s32.totalorder %s325_s1, %s201_s30  ;;  %s29_s27 = int_to_ptr.vmem [resolvable:$true] %s28_s27 }
  0x15   :  { %p205_p9 = scmp.lt.u32.totalorder %s201_s30, %s325_s1 }
  0x17   :  { %p207_p10 = pnand %p205_p9, %p202_p8 }
  0x19   :  { %210 = shalt.err (!%p207_p10)
}
  0x1a   :  { %s211_s8 = scalar_lea.vmem %s29_s27, 256  ;;  %p216_p12 = scmp.lt.s32.totalorder %s29_s27, %s29_s27 }
  0x1b   :  { %p212_p11 = scmp.ne.s32.totalorder %s29_s27, %s211_s8  ;;  %p217_p13 = scmp.lt.s32.totalorder %s211_s8, %s211_s8 }
  0x1d   :  { %p218_p0 = por %p217_p13, %p216_p12 }
  0x1f   :  { %p219_p1 = pnand %p218_p0, %p212_p11 }
  0x21   :  { %222 = shalt.err (!%p219_p1)
}
  0x22   :  { %34 = dma.hbm_to_vmem [thread:$0]  %s325_s1, 256, %s29_s27, [#allocation6], %s252_s22, %s252_s22, %s253_s23  }
  0x23   :  { %245 = dma.done.wait [#allocation3], 256  }
  0x24   :  { %246 = vsyncadd [#allocation3], 4294967040 }
  0x25   :  { %247 = dma.done.wait [#allocation6], 256  }
  0x26   :  { %248 = vsyncadd [#allocation6], 4294967040  ;;  %vm54_vm0 = vcmask 130048   ;;  %v45_v0 = vld [vmem:[#allocation5] sm:$0xff]  ;;  %v46_v1 = vld [vmem:[#allocation5 + $0x8] sm:$0xff]  ;;  %s255_s12 = smov [#allocation7]  }
  0x27   :  { %v43_v2 = vld [vmem:[#allocation2] sm:$0xff]  ;;  %v170_v3 = vpack.c.bf16 %v46_v1, %v45_v0  ;;  %v44_v4 = vld [vmem:[#allocation2 + $0x8] sm:$0xff]  ;;  %s143_s1 = sshll.u32 %s255_s12, 4  ;;  %s144_s1 = int_to_ptr.vmem [resolvable:$true] %s143_s1 }
  0x28   :  { %167 = vmatprep.mubr.msk.f32.mxu0 %vm54_vm0, %v43_v2  ;;  %v156_v5 = vld [vmem:[%s326_s2] ss:$0 sm:$0xff]  ;;  %s223_s13 = scalar_lea.vmem %s144_s1, 256  ;;  %p228_p3 = scmp.lt.s32.totalorder %s144_s1, %s144_s1 }
  0x29   :  { %171 = vmatprep.subr.bf16.mxu0 %v170_v3  ;;  %p224_p2 = scmp.ne.s32.totalorder %s144_s1, %s223_s13  ;;  %p229_p4 = scmp.lt.s32.totalorder %s223_s13, %s223_s13 }
  0x2a   :  { %173 = vmatpush3.bf16.msra.mxu0 %v170_v3 }
  0x2b   :  { %p230_p5 = por %p229_p4, %p228_p3 }
  0x2d   :  { %168 = vmatmul.mubr.msk.f32.vlgmr.msra.gmra.mrb[0].mxu0 %vm54_vm0, %v44_v4  ;;  %p231_p6 = pnand %p230_p5, %p224_p2 }
 0x100   :  { %v169_v6 = vpop.f32.mrb[0].mxu0 }
 0x101   :  { %v133_v7 = vadd.f32 %v169_v6, %v156_v5  ;;  %v127_v8 = vpop.f32.mrb[1].mxu0 }
 0x102   :  { %v128_v9 = vadd.f32 %v156_v5, %v127_v8 }
 0x103   :  { %137 = vst [vmem:[#allocation7 + $0x8] sm:$0xff] %v133_v7 }
 0x104   :  { %136 = vst [vmem:[#allocation7] sm:$0xff] %v128_v9 }
 0x105   :  { %234 = shalt.err (!%p231_p6)
}
 0x106   :  { %s235_s2 = scalar_lea.hbm %s327_s3, 256 }
 0x107   :  { %p236_p7 = scmp.ne.s32.totalorder %s327_s3, %s235_s2  ;;  %p239_p8 = scmp.lt.u32.totalorder %s235_s2, %s327_s3 }
 0x109   :  { %p241_p9 = pnand %p239_p8, %p236_p7 }
 0x10b   :  { %244 = shalt.err (!%p241_p9)
}
 0x10c   :  { %149 = dma.vmem_to_hbm [thread:$0]  %s144_s1, 256, %s327_s3, [#allocation4], %s252_s22, %s252_s22, %s253_s23  }
 0x10d   :  { %249 = dma.done.wait [#allocation4], 256  }
 0x10e   :  { %250 = vsyncadd [#allocation4], 4294967040 }
 0x10f   :  { %153 = vsyncpa [#allocation3], 1 }
 0x110   :  { %154 = vsyncpa [#allocation6], 1 }
 0x111   :  { %155 = vsyncpa [#allocation4], 1 }

</bundles_post_ra>
